<compile_context>
chip_gen: v5e
topology: v5e:2x2
jax: 0.10.0
libtpu: 0.0.40
codegen_flags: <defaults>
</compile_context>

<pallas_src>
import functools

import jax
import jax.numpy as jnp
from jax.experimental import pallas as pl
from jax.experimental.pallas import tpu as pltpu


def _round_up(n, m):
    return ((n + m - 1) // m) * m


def _mlp_kernel(x_ref, w1_ref, b1_ref, w2_ref, b2_ref, w3_ref, o_ref):
    """Fused 3-layer MLP, feature-major:
    y^T = W3 @ relu(W2 @ relu(W1 @ x^T + b1) + b2)."""
    xt = x_ref[...].astype(jnp.float32)  # (F, TB)

    # fc1 + relu1 : (8, F) @ (F, TB) -> (8, TB), lane-dense bias/relu.
    h1 = jnp.dot(w1_ref[...], xt, preferred_element_type=jnp.float32) + b1_ref[...]
    h1 = jnp.maximum(h1, 0.0)

    # fc2 + relu2 : (8, 8) @ (8, TB) -> (8, TB)
    h2 = jnp.dot(w2_ref[...], h1, preferred_element_type=jnp.float32) + b2_ref[...]
    h2 = jnp.maximum(h2, 0.0)

    # fc3 (no bias) : (n_thetas, 8) @ (8, TB) -> (n_thetas, TB); single
    # unmasked, lane-dense store of the compact (unpadded) output tile.
    o_ref[...] = jnp.dot(
        w3_ref[...], h2, preferred_element_type=jnp.float32
    ).astype(o_ref.dtype)


@functools.partial(jax.jit, static_argnames=("tb",))
def complex_intercept_default_tabular(x, params, *, tb=4096):
    """Forward pass.

    x:       (B, n_features) float32 or bfloat16
    params:  dict with w1 (8, n_features), b1 (8, 1), w2 (8, 8), b2 (8, 1),
             w3 (n_thetas, 8) -- PyTorch-native (out, in) weight layout, f32.
    returns: (B, n_thetas) float32
    """
    w1, b1, w2, b2, w3 = (
        params["w1"],
        params["b1"],
        params["w2"],
        params["b2"],
        params["w3"],
    )
    B, F = x.shape
    n_thetas = w3.shape[0]

    # Batch tile: multiple of 128 (lane axis of x^T and y^T blocks).
    # For v7x megacore, pick B >= 2*tb (or lower tb) so the grid has >= 2 tiles.
    TB = max(128, min(_round_up(tb, 128), _round_up(B, 128)))
    B_pad = _round_up(B, TB)
    grid = (B_pad // TB,)

    # Feature-major input: (F, B_pad); zero-pad the batch (lane) axis.
    x_t = jnp.pad(x.T, ((0, 0), (0, B_pad - B)))

    # Weights/biases: constant index_map -> resident in VMEM across grid steps.
    resident = lambda a: pl.BlockSpec(a.shape, lambda i: (0,) * a.ndim)

    flops = 2 * B_pad * (F * 8 + 8 * 8 + 8 * n_thetas)
    bytes_accessed = (
        x_t.size * x_t.dtype.itemsize
        + B_pad * n_thetas * 4
        + sum(a.size * a.dtype.itemsize for a in (w1, b1, w2, b2, w3))
    )

    out_t = pl.pallas_call(
        _mlp_kernel,
        out_shape=jax.ShapeDtypeStruct((n_thetas, B_pad), jnp.float32),
        grid=grid,
        in_specs=[
            pl.BlockSpec((F, TB), lambda i: (0, i)),
            resident(w1),
            resident(b1),
            resident(w2),
            resident(b2),
            resident(w3),
        ],
        out_specs=pl.BlockSpec((n_thetas, TB), lambda i: (0, i)),
        compiler_params=pltpu.CompilerParams(
            dimension_semantics=("parallel",),
        ),
        cost_estimate=pl.CostEstimate(
            flops=flops, transcendentals=0, bytes_accessed=bytes_accessed
        ),
    )(x_t, w1, b1, w2, b2, w3)

    # Drop padded batch columns (they hold relu(b)-propagated junk) and return
    # batch-major (B, n_thetas).
    return out_t[:, :B].T


def init_params(key, n_features=1, n_thetas=20):
    """Deterministic init mirroring nn.Linear's U(-1/sqrt(fan_in), 1/sqrt(fan_in)).

    Weights are kept in PyTorch-native (out, in) layout; biases as (out, 1).
    (If loading a real state_dict: use fc*.weight as-is, reshape biases to (out, 1).)
    """
    k1, k2, k3, k4, k5 = jax.random.split(key, 5)

    def u(k, shape, fan_in):
        bound = 1.0 / jnp.sqrt(jnp.float32(fan_in))
        return jax.random.uniform(
            k, shape, dtype=jnp.float32, minval=-bound, maxval=bound
        )

    return {
        "w1": u(k1, (8, n_features), n_features),
        "b1": u(k2, (8, 1), n_features),
        "w2": u(k3, (8, 8), 8),
        "b2": u(k4, (8, 1), 8),
        "w3": u(k5, (n_thetas, 8), 8),
    }


def reference_forward(x, p):
    x = x.astype(jnp.float32)
    h1 = jnp.maximum(x @ p["w1"].T + p["b1"].T, 0.0)
    h2 = jnp.maximum(h1 @ p["w2"].T + p["b2"].T, 0.0)
    return h2 @ p["w3"].T


if __name__ == "__main__":
    key = jax.random.PRNGKey(0)
    kx, kx2, kp = jax.random.split(key, 3)

    n_features, n_thetas = 4, 20
    params = init_params(kp, n_features=n_features, n_thetas=n_thetas)

    # --- Test 1: tiny batch (single grid step), f32 I/O ---
    batch = 8
    x = jax.random.normal(kx, (batch, n_features), dtype=jnp.float32)
    out = jax.block_until_ready(complex_intercept_default_tabular(x, params))
    ref = reference_forward(x, params)
    assert out.shape == (batch, n_thetas)
    assert jnp.allclose(out, ref, atol=1e-5, rtol=1e-5), "f32 mismatch vs reference"

    # --- Test 2: multi-tile batch (not a multiple of the tile), bf16 input ---
    batch2 = 300
    x2 = jax.random.normal(kx2, (batch2, n_features), dtype=jnp.float32).astype(
        jnp.bfloat16
    )
    out2 = jax.block_until_ready(
        complex_intercept_default_tabular(x2, params, tb=128)
    )
    ref2 = reference_forward(x2, params)  # same bf16-quantized input, f32 compute
    assert out2.shape == (batch2, n_thetas)
    assert jnp.allclose(out2, ref2, atol=1e-4, rtol=1e-4), "bf16-in mismatch vs reference"

    print("KERNEL_OK")
</pallas_src>

<mosaic_0001>
module attributes {stable_mosaic.version = 11 : i64} {
  func.func @_mlp_kernel(%arg0: i32, %arg1: memref<4x128xf32, #tpu.memory_space<vmem>>, %arg2: memref<8x4xf32, #tpu.memory_space<vmem>>, %arg3: memref<8x1xf32, #tpu.memory_space<vmem>>, %arg4: memref<8x8xf32, #tpu.memory_space<vmem>>, %arg5: memref<8x1xf32, #tpu.memory_space<vmem>>, %arg6: memref<20x8xf32, #tpu.memory_space<vmem>>, %arg7: memref<20x128xf32, #tpu.memory_space<vmem>>) attributes {dimension_semantics = [#tpu.dimension_semantics<parallel>], iteration_bounds = array<i64: 1>, scalar_prefetch = 0 : i64, scratch_operands = 0 : i64, tpu.core_type = #tpu.core_type<tc>, window_params = [{transform_indices = @transform_0, window_bounds = array<i64: 4, 128>}, {pipeline_mode = #tpu.pipeline_mode<synchronous>, transform_indices = @transform_1, window_bounds = array<i64: 8, 4>}, {pipeline_mode = #tpu.pipeline_mode<synchronous>, transform_indices = @transform_2, window_bounds = array<i64: 8, 1>}, {pipeline_mode = #tpu.pipeline_mode<synchronous>, transform_indices = @transform_3, window_bounds = array<i64: 8, 8>}, {pipeline_mode = #tpu.pipeline_mode<synchronous>, transform_indices = @transform_4, window_bounds = array<i64: 8, 1>}, {pipeline_mode = #tpu.pipeline_mode<synchronous>, transform_indices = @transform_5, window_bounds = array<i64: 20, 8>}, {transform_indices = @transform_6, window_bounds = array<i64: 20, 128>}]} {
    %c0 = arith.constant 0 : index
    %c0_0 = arith.constant 0 : index
    %0 = vector.load %arg1[%c0, %c0_0] : memref<4x128xf32, #tpu.memory_space<vmem>>, vector<4x128xf32>
    %c0_1 = arith.constant 0 : index
    %c0_2 = arith.constant 0 : index
    %1 = vector.load %arg2[%c0_1, %c0_2] : memref<8x4xf32, #tpu.memory_space<vmem>>, vector<8x4xf32>
    %cst = arith.constant dense<0.000000e+00> : vector<8x128xf32>
    %2 = tpu.matmul %1, %0, %cst {dimension_numbers = #tpu.dot_dimension_numbers<[1], [0], [0], [1], [0, 0, 1, 1], [], []>} : vector<8x4xf32>, vector<4x128xf32>, vector<8x128xf32> -> vector<8x128xf32>
    %c0_3 = arith.constant 0 : index
    %c0_4 = arith.constant 0 : index
    %3 = vector.load %arg3[%c0_3, %c0_4] : memref<8x1xf32, #tpu.memory_space<vmem>>, vector<8x1xf32>
    %4 = vector.broadcast %3 : vector<8x1xf32> to vector<8x128xf32>
    %5 = arith.addf %2, %4 : vector<8x128xf32>
    %cst_5 = arith.constant 0.000000e+00 : f32
    %6 = vector.broadcast %cst_5 : f32 to vector<8x128xf32>
    %7 = arith.maximumf %5, %6 : vector<8x128xf32>
    %c0_6 = arith.constant 0 : index
    %c0_7 = arith.constant 0 : index
    %8 = vector.load %arg4[%c0_6, %c0_7] : memref<8x8xf32, #tpu.memory_space<vmem>>, vector<8x8xf32>
    %cst_8 = arith.constant dense<0.000000e+00> : vector<8x128xf32>
    %9 = tpu.matmul %8, %7, %cst_8 {dimension_numbers = #tpu.dot_dimension_numbers<[1], [0], [0], [1], [0, 0, 1, 1], [], []>} : vector<8x8xf32>, vector<8x128xf32>, vector<8x128xf32> -> vector<8x128xf32>
    %c0_9 = arith.constant 0 : index
    %c0_10 = arith.constant 0 : index
    %10 = vector.load %arg5[%c0_9, %c0_10] : memref<8x1xf32, #tpu.memory_space<vmem>>, vector<8x1xf32>
    %11 = vector.broadcast %10 : vector<8x1xf32> to vector<8x128xf32>
    %12 = arith.addf %9, %11 : vector<8x128xf32>
    %cst_11 = arith.constant 0.000000e+00 : f32
    %13 = vector.broadcast %cst_11 : f32 to vector<8x128xf32>
    %14 = arith.maximumf %12, %13 : vector<8x128xf32>
    %c0_12 = arith.constant 0 : index
    %c0_13 = arith.constant 0 : index
    %15 = vector.load %arg6[%c0_12, %c0_13] : memref<20x8xf32, #tpu.memory_space<vmem>>, vector<20x8xf32>
    %cst_14 = arith.constant dense<0.000000e+00> : vector<20x128xf32>
    %16 = tpu.matmul %15, %14, %cst_14 {dimension_numbers = #tpu.dot_dimension_numbers<[1], [0], [0], [1], [0, 0, 1, 1], [], []>} : vector<20x8xf32>, vector<8x128xf32>, vector<20x128xf32> -> vector<20x128xf32>
    %c0_15 = arith.constant 0 : index
    %c0_16 = arith.constant 0 : index
    %17 = vector.load %arg7[%c0_15, %c0_16] : memref<20x128xf32, #tpu.memory_space<vmem>>, vector<20x128xf32>
    tpu.vector_store %arg7[%c0_15, %c0_16], %16 {strides = array<i32>} : memref<20x128xf32, #tpu.memory_space<vmem>>, vector<20x128xf32>,
    return
  }
  func.func @transform_0(%arg0: i32) -> (i32, i32) {
    %c0_i32 = arith.constant 0 : i32
    %c0_i32_0 = arith.constant 0 : i32
    return %c0_i32, %arg0 : i32, i32
  }
  func.func @transform_1(%arg0: i32) -> (i32, i32) {
    %c0_i32 = arith.constant 0 : i32
    %c0_i32_0 = arith.constant 0 : i32
    %c0_i32_1 = arith.constant 0 : i32
    return %c0_i32, %c0_i32_0 : i32, i32
  }
  func.func @transform_2(%arg0: i32) -> (i32, i32) {
    %c0_i32 = arith.constant 0 : i32
    %c0_i32_0 = arith.constant 0 : i32
    %c0_i32_1 = arith.constant 0 : i32
    return %c0_i32, %c0_i32_0 : i32, i32
  }
  func.func @transform_3(%arg0: i32) -> (i32, i32) {
    %c0_i32 = arith.constant 0 : i32
    %c0_i32_0 = arith.constant 0 : i32
    %c0_i32_1 = arith.constant 0 : i32
    return %c0_i32, %c0_i32_0 : i32, i32
  }
  func.func @transform_4(%arg0: i32) -> (i32, i32) {
    %c0_i32 = arith.constant 0 : i32
    %c0_i32_0 = arith.constant 0 : i32
    %c0_i32_1 = arith.constant 0 : i32
    return %c0_i32, %c0_i32_0 : i32, i32
  }
  func.func @transform_5(%arg0: i32) -> (i32, i32) {
    %c0_i32 = arith.constant 0 : i32
    %c0_i32_0 = arith.constant 0 : i32
    %c0_i32_1 = arith.constant 0 : i32
    return %c0_i32, %c0_i32_0 : i32, i32
  }
  func.func @transform_6(%arg0: i32) -> (i32, i32) {
    %c0_i32 = arith.constant 0 : i32
    %c0_i32_0 = arith.constant 0 : i32
    return %c0_i32, %arg0 : i32, i32
  }
}

</mosaic_0001>

<bundles_post_ra>
// kernel: complex_intercept_default_tabular.1
= control target key start
LH: loop header
LB: loop body
LE: loop exit
PB: predicated region body
PF: predicated region fallthrough
CT: control target
= control target key end

     0   :  { %vm35_vm0 = vcmask 1043456   ;;  %vm31_vm1 = vcmask 31744   ;;  %v146_v2 = vmov 0   ;;  %vm67_vm2 = vcmask 64512   ;;  %s215_s0 = inlined_call_operand.vmem [shape: f32[4,128], index: 0, kind: input, shape index: {}]   ;;  %s216_s1 = inlined_call_operand.vmem [shape: f32[8,4], index: 1, kind: input, shape index: {}]   ;;  %s217_s2 = inlined_call_operand.vmem [shape: f32[8,1], index: 2, kind: input, shape index: {}]   ;;  %s218_s4 = inlined_call_operand.vmem [shape: f32[8,1], index: 4, kind: input, shape index: {}]   ;;  %s219_s3 = inlined_call_operand.vmem [shape: f32[8,8], index: 3, kind: input, shape index: {}]   ;;  %s220_s5 = inlined_call_operand.vmem [shape: f32[20,8], index: 5, kind: input, shape index: {}]   ;;  %s221_s6 = inlined_call_operand.vmem [shape: f32[20,128], index: 6, kind: output, shape index: {}]  }
   0x1   :  { %v23_v0 = vld [vmem:[%s215_s0] sm:$0xf]  ;;  %145 = vset.pattern.permute.xlu0 %v146_v2  ;;  %v93_v14 = vld [vmem:[%s220_s5 + $0x8] sm:$0xff]  ;;  %v94_v16 = vld [vmem:[%s220_s5 + $0x10] sm:$0xf] }
   0x2   :  { %v24_v1 = vld [vmem:[%s216_s1] sm:$0xff]  ;;  %137 = vmatpush.msk.msra.mxu0 %vm35_vm0, %v23_v0 }
   0x3   :  { %v25_v3 = vld [vmem:[%s217_s2] sm:$0xff]  ;;  %138 = vmatmul.msk.f32.vlgmr.msra.gmra.mxu0 %vm31_vm1, %v24_v1 }
   0x4   :  { %28 = vperm.xlu0 %145, %v25_v3   ;;  %v61_v4 = vld [vmem:[%s218_s4] sm:$0xff] }
   0x5   :  { %v60_v9 = vld [vmem:[%s219_s3] sm:$0xff] }
   0x6   :  { %v92_v15 = vld [vmem:[%s220_s5] sm:$0xff] }
   0xc   :  { %64 = vperm.xlu0 %145, %v61_v4  }
  0x76   :  { %v29_v5 = vpop.permute.xlu0 %28 }
  0x7e   :  { %v65_v10 = vpop.permute.xlu0 %64 }
  0x80   :  { %v56_v6 = vpop.f32.mrf.mxu0 }
  0x81   :  { %v57_v7 = vadd.f32 %v56_v6, %v29_v5 }
  0x83   :  { %v59_v8 = vmax.f32 %v57_v7, 0.0 }
  0x85   :  { %86 = vmatpush.msra.mxu1 %v59_v8 }
  0x86   :  { %139 = vmatmul.msk.f32.vlgmr.msra.gmra.mxu1 %vm67_vm2, %v60_v9 }
 0x103   :  { %v88_v11 = vpop.f32.mrf.mxu1 }
 0x104   :  { %v89_v12 = vadd.f32 %v88_v11, %v65_v10 }
 0x106   :  { %v91_v13 = vmax.f32 %v89_v12, 0.0 }
 0x108   :  { %119 = vmatpush.msra.mxu2 %v91_v13  ;;  %143 = vmatpush.msra.mxu3 %v91_v13 }
 0x109   :  { %141 = vmatmul.msk.f32.vlgmr.msra.gmra.mxu3 %vm67_vm2, %v93_v14  ;;  %140 = vmatmul.msk.f32.vlgmr.msra.gmra.mxu2 %vm67_vm2, %v92_v15 }
 0x111   :  { %142 = vmatmul.msk.f32.gmra.mxu3 %vm67_vm2, %v94_v16 }
 0x18c   :  { %v124_v17 = vpop.f32.mrf.mxu3  ;;  %v121_v18 = vpop.f32.mrf.mxu2 }
 0x18d   :  { %131 = vst [vmem:[%s221_s6 + $0x8] sm:$0xff] %v124_v17 }
 0x18e   :  { %130 = vst [vmem:[%s221_s6] sm:$0xff] %v121_v18 }
 0x194   :  { %v127_v19 = vpop.f32.mrf.mxu3 }
 0x195   :  { %132 = vst [vmem:[%s221_s6 + $0x10] sm:$0xf] %v127_v19 }

</bundles_post_ra>
